<compile_context>
chip_gen: v7x
topology: tpu7x:2x2x1
jax: 0.10.0
libtpu: 0.0.40
codegen_flags: <defaults>
</compile_context>

<pallas_src>
import jax
import jax.numpy as jnp
from jax.experimental import pallas as pl
from jax.experimental.pallas import tpu as pltpu


def _conv1x1_kernel(x_ref, w_ref, b_ref, o_ref):
    # x_ref: (1, rows_tile, L)        VMEM  -- rows on sublanes, L pixels on lanes
    # w_ref: (Cout,)                  SMEM scalars
    # b_ref: (Cout,)                  SMEM scalars
    # o_ref: (1, Cout, rows_tile, L)  VMEM  -- NCHW-ordered, lane/sublane dense
    x = x_ref[...]                                  # (1, rows_tile, L)
    cout = o_ref.shape[1]
    # Cout broadcast-FMAs on the VPU, fused into one dense (unmasked) store.
    y = jnp.stack([x * w_ref[c] + b_ref[c] for c in range(cout)], axis=1)
    o_ref[...] = y.astype(o_ref.dtype)


def _choose_lane_tile(hw):
    # Lane-dense tile width: a multiple of 128 (full extent for tiny images).
    for lane in (512, 256, 128):
        if hw >= lane:
            return lane
    return hw


def _choose_row_tile(num_rows, lane, target_bytes=1 << 20):
    # Target ~1 MiB of input per block. Output block is Cout(=3)x larger and
    # everything is double-buffered -> ~8x input block bytes of VMEM, which
    # fits the default scoped VMEM on v5e (16 MiB) and v6e/v7x (32 MiB), and
    # v7x's 64 MiB physical VMEM with headroom.
    rows = max(8, ((target_bytes // (lane * 4)) // 8) * 8)
    return num_rows if rows >= num_rows else rows


def conv1x1(x_nchw, weight, bias, out_dtype=None):
    """1x1 Conv2d (Cin=1, stride 1) as a VPU broadcast-FMA Pallas kernel.

    x_nchw : (N, 1, H, W) float32
    weight : (Cout, 1, 1, 1) or (Cout, 1) or (Cout,) float32
    bias   : (Cout,) float32
    returns: (N, Cout, H, W) in out_dtype (default: input dtype)
    """
    N, Cin, H, W = x_nchw.shape
    assert Cin == 1, "net_top is Conv2d(1, 3, 1, 1): Cin must be 1"
    w_vec = weight.reshape(-1).astype(jnp.float32)   # (Cout,)
    b_vec = bias.reshape(-1).astype(jnp.float32)     # (Cout,)
    Cout = w_vec.shape[0]
    out_dtype = x_nchw.dtype if out_dtype is None else out_dtype

    HW = H * W
    lane = _choose_lane_tile(HW)
    hw_pad = pl.cdiv(HW, lane) * lane

    # Cin == 1 -> NCHW flatten to (N, H*W) is a pure reshape, no transpose.
    x_flat = x_nchw.reshape(N, HW)
    if hw_pad != HW:
        x_flat = jnp.pad(x_flat, ((0, 0), (0, hw_pad - HW)))
    num_rows = hw_pad // lane
    x3 = x_flat.reshape(N, num_rows, lane)           # free reshape (contiguous)

    rows_tile = _choose_row_tile(num_rows, lane)
    grid = (N, pl.cdiv(num_rows, rows_tile))         # ragged edge handled by Pallas

    out = pl.pallas_call(
        _conv1x1_kernel,
        out_shape=jax.ShapeDtypeStruct((N, Cout, num_rows, lane), out_dtype),
        grid_spec=pltpu.PrefetchScalarGridSpec(
            num_scalar_prefetch=0,
            grid=grid,
            in_specs=[
                # sublane-dense rows, lane-dense pixels
                pl.BlockSpec((1, rows_tile, lane), lambda n, i: (n, i, 0)),
                # 3-element weight / bias vectors live in SMEM (no VMEM DMA pair)
                pl.BlockSpec(memory_space=pltpu.MemorySpace.SMEM),
                pl.BlockSpec(memory_space=pltpu.MemorySpace.SMEM),
            ],
            # NCHW-ordered output tile; last two dims stay layout-dense
            out_specs=pl.BlockSpec((1, Cout, rows_tile, lane),
                                   lambda n, i: (n, 0, i, 0)),
        ),
        compiler_params=pltpu.CompilerParams(
            dimension_semantics=("parallel", "parallel"),  # megacore split on v7x
        ),
    )(x3, w_vec, b_vec)

    # (N, Cout, R, L) -> (N, Cout, H*W) -> (N, Cout, H, W): pure reshapes
    # (plus a narrow slice only when HW needed padding).
    out = out.reshape(N, Cout, hw_pad)
    if hw_pad != HW:
        out = out[:, :, :HW]
    return out.reshape(N, Cout, H, W)


def module_single_forward(x, params):
    """Forward pass of MODULE_single (visible portion)."""
    y = conv1x1(x, params["net_top_w"], params["net_top_b"])
    # TODO(synk): apply DenseUnet_2d here once its definition is available
    # (ideally fuse its first conv with this 1x1 conv to avoid the f32
    #  (N,3,H,W) HBM round-trip).
    return y


def init_params(key):
    kw, kb = jax.random.split(key)
    cout, cin = 3, 1
    # PyTorch Conv2d default init: uniform in +-1/sqrt(fan_in).
    bound = 1.0 / jnp.sqrt(float(cin * 1 * 1))
    w = jax.random.uniform(kw, (cout, cin, 1, 1), jnp.float32, -bound, bound)
    b = jax.random.uniform(kb, (cout,), jnp.float32, -bound, bound)
    return {"net_top_w": w, "net_top_b": b}


if __name__ == "__main__":
    key = jax.random.PRNGKey(0)
    k_in, k_par = jax.random.split(key)

    # Small shapes consistent with the module: Conv2d(1, 3, 1, 1) -> Cin = 1.
    N, Cin, H, W = 2, 1, 16, 16
    x = jax.random.normal(k_in, (N, Cin, H, W), jnp.float32)
    params = init_params(k_par)

    out = module_single_forward(x, params)
    out = jax.block_until_ready(out)

    # Cross-check against plain-JAX reference of the 1x1 conv.
    w_ref = params["net_top_w"].reshape(3, 1)
    ref = (jnp.einsum("nchw,oc->nohw", x, w_ref)
           + params["net_top_b"][None, :, None, None])
    assert out.shape == (N, 3, H, W)
    assert jnp.allclose(out, ref, atol=1e-5, rtol=1e-5)

    print("KERNEL_OK")
</pallas_src>

<mosaic_0001>
module attributes {stable_mosaic.version = 11 : i64} {
  func.func @_conv1x1_kernel(%arg0: i32, %arg1: i32, %arg2: memref<1x1x256xf32, #tpu.memory_space<vmem>>, %arg3: memref<3xf32, #tpu.memory_space<smem>>, %arg4: memref<3xf32, #tpu.memory_space<smem>>, %arg5: memref<1x3x1x256xf32, #tpu.memory_space<vmem>>) attributes {dimension_semantics = [#tpu.dimension_semantics<parallel>, #tpu.dimension_semantics<parallel>], iteration_bounds = array<i64: 2, 1>, scalar_prefetch = 0 : i64, scratch_operands = 0 : i64, tpu.core_type = #tpu.core_type<tc>, window_params = [{transform_indices = @transform_0, window_bounds = array<i64: 1, 1, 256>}, {transform_indices = @transform_1, window_bounds = array<i64: 3>}, {transform_indices = @transform_2, window_bounds = array<i64: 3>}, {transform_indices = @transform_3, window_bounds = array<i64: 1, 3, 1, 256>}]} {
    %c0 = arith.constant 0 : index
    %c0_0 = arith.constant 0 : index
    %c0_1 = arith.constant 0 : index
    %0 = vector.load %arg2[%c0, %c0_0, %c0_1] : memref<1x1x256xf32, #tpu.memory_space<vmem>>, vector<1x1x256xf32>
    %c0_2 = arith.constant 0 : index
    %1 = memref.load %arg3[%c0_2] : memref<3xf32, #tpu.memory_space<smem>>
    %2 = vector.broadcast %1 : f32 to vector<1x1x256xf32>
    %3 = arith.mulf %0, %2 : vector<1x1x256xf32>
    %c0_3 = arith.constant 0 : index
    %4 = memref.load %arg4[%c0_3] : memref<3xf32, #tpu.memory_space<smem>>
    %5 = vector.broadcast %4 : f32 to vector<1x1x256xf32>
    %6 = arith.addf %3, %5 : vector<1x1x256xf32>
    %c1 = arith.constant 1 : index
    %7 = memref.load %arg3[%c1] : memref<3xf32, #tpu.memory_space<smem>>
    %8 = vector.broadcast %7 : f32 to vector<1x1x256xf32>
    %9 = arith.mulf %0, %8 : vector<1x1x256xf32>
    %c1_4 = arith.constant 1 : index
    %10 = memref.load %arg4[%c1_4] : memref<3xf32, #tpu.memory_space<smem>>
    %11 = vector.broadcast %10 : f32 to vector<1x1x256xf32>
    %12 = arith.addf %9, %11 : vector<1x1x256xf32>
    %c2 = arith.constant 2 : index
    %13 = memref.load %arg3[%c2] : memref<3xf32, #tpu.memory_space<smem>>
    %14 = vector.broadcast %13 : f32 to vector<1x1x256xf32>
    %15 = arith.mulf %0, %14 : vector<1x1x256xf32>
    %c2_5 = arith.constant 2 : index
    %16 = memref.load %arg4[%c2_5] : memref<3xf32, #tpu.memory_space<smem>>
    %17 = vector.broadcast %16 : f32 to vector<1x1x256xf32>
    %18 = arith.addf %15, %17 : vector<1x1x256xf32>
    %19 = vector.shape_cast %6 : vector<1x1x256xf32> to vector<1x1x1x256xf32>
    %20 = vector.shape_cast %12 : vector<1x1x256xf32> to vector<1x1x1x256xf32>
    %21 = vector.shape_cast %18 : vector<1x1x256xf32> to vector<1x1x1x256xf32>
    %22 = tpu.concatenate %19, %20, %21 in 1 : vector<1x1x1x256xf32>, vector<1x1x1x256xf32>, vector<1x1x1x256xf32> -> vector<1x3x1x256xf32>
    %c0_6 = arith.constant 0 : index
    %c0_7 = arith.constant 0 : index
    %c0_8 = arith.constant 0 : index
    %c0_9 = arith.constant 0 : index
    %23 = vector.load %arg5[%c0_6, %c0_7, %c0_8, %c0_9] : memref<1x3x1x256xf32, #tpu.memory_space<vmem>>, vector<1x3x1x256xf32>
    tpu.vector_store %arg5[%c0_6, %c0_7, %c0_8, %c0_9], %22 {strides = array<i32>} : memref<1x3x1x256xf32, #tpu.memory_space<vmem>>, vector<1x3x1x256xf32>,
    return
  }
  func.func @transform_0(%arg0: i32, %arg1: i32) -> (i32, i32, i32) {
    %c0_i32 = arith.constant 0 : i32
    %c0_i32_0 = arith.constant 0 : i32
    return %arg0, %arg1, %c0_i32 : i32, i32, i32
  }
  func.func @transform_1(%arg0: i32, %arg1: i32) -> i32 {
    %c0_i32 = arith.constant 0 : i32
    %c0_i32_0 = arith.constant 0 : i32
    return %c0_i32 : i32
  }
  func.func @transform_2(%arg0: i32, %arg1: i32) -> i32 {
    %c0_i32 = arith.constant 0 : i32
    %c0_i32_0 = arith.constant 0 : i32
    return %c0_i32 : i32
  }
  func.func @transform_3(%arg0: i32, %arg1: i32) -> (i32, i32, i32, i32) {
    %c0_i32 = arith.constant 0 : i32
    %c0_i32_0 = arith.constant 0 : i32
    %c0_i32_1 = arith.constant 0 : i32
    return %arg0, %c0_i32, %arg1, %c0_i32_0 : i32, i32, i32, i32
  }
}

</mosaic_0001>

<bundles_post_ra>
// kernel: tpu_custom_call.1
= control target key start
LH: loop header
LB: loop body
LE: loop exit
PB: predicated region body
PF: predicated region fallthrough
CT: control target
= control target key end

     0   :  { %8 = vsyncpa [#allocation3], 0  ;;  %s882_s0 = inlined_call_operand.hbm [shape: f32[2,1,256], index: 0, kind: input, shape index: {}]   ;;  %s883_s1 = inlined_call_operand.vmem [shape: f32[3], index: 1, kind: input, shape index: {}]   ;;  %s884_s2 = inlined_call_operand.vmem [shape: f32[3], index: 2, kind: input, shape index: {}]   ;;  %s885_s3 = inlined_call_operand.hbm [shape: f32[2,3,1,256], index: 3, kind: output, shape index: {}]  }
   0x1   :  { %10 = vsyncpa [#allocation3 + $0x1], 0 }
   0x2   :  { %11 = vsyncpa [#allocation5], 0 }
   0x3   :  { %12 = vsyncpa [#allocation8], 0 }
   0x4   :  { %13 = vsyncpa [#allocation4], 0 }
   0x5   :  { %15 = vsyncpa [#allocation4 + $0x1], 0  ;;  %s669_s12 = smov 0   ;;  %s671_s13 = smov 0  }
   0x6   :  { %s673_s14 = smov 0   ;;  %s675_s15 = smov 0  }
   0x7   :  { %s677_s16 = smov 0   ;;  %s679_s17 = smov 0  }
   0x8 LB: > { %s383_s18 = sadd.s32 4294967295, %s641_s17   ;;  %s384_s19 = sadd.s32 4294967294, %s641_s17   ;;  %s641_s17 = sphi %s679_s17, %s21_s17   ;;  %s637_s16 = sphi %s677_s16, %s908_s16   ;;  %s633_s15 = sphi %s675_s15, %s907_s15   ;;  %s629_s14 = sphi %s673_s14, %s906_s14   ;;  %s625_s13 = sphi %s671_s13, %s905_s13   ;;  %s621_s12 = sphi %s669_s12, %s904_s12  }
   0x9   : > { %p55_p0 = scmp.ne.s32.totalorder %s625_s13, %s621_s12  ;;  %p703_p1 = scmp.eq.s32.totalorder %s383_s18, 0 }
   0xa   : > { %p707_p2 = scmp.eq.s32.totalorder %s383_s18, 1  ;;  %p129_p3 = scmp.eq.s32.totalorder %s384_s19, 1 }
   0xb   : > { %s890_s20 = scalar_select %p703_p1, 1, 0 }
   0xc   : > { %s891_s21 = scalar_select %p707_p2, 1, 0 }
   0xd   : > { %p713_p4 = por %p703_p1, %p55_p0  ;;  %p385_p5 = scmp.ge.s32.totalorder %s641_s17, 1 }
   0xe   : > { %p718_p6 = por %p129_p3, %p55_p0  ;;  %p136_p7 = scmp.lt.s32.totalorder %s641_s17, 3 }
   0xf   : > { %s892_s22 = scalar_select %p713_p4, 1, 0 }
  0x10   : > { %s893_s23 = scalar_select %p718_p6, 1, 0 }
  0x11   : > { %s149_s26 = sshll.u32 %s883_s1, 4  ;;  %p726_p8 = pnand %p385_p5, %p136_p7  ;;  %s150_s26 = int_to_ptr.vmem [resolvable:$true] %s149_s26 }
  0x12   : > { %s160_s30 = sshll.u32 %s884_s2, 4  ;;  %s491_s5 = scalar_lea.vmem %s150_s26, 16  ;;  %s161_s30 = int_to_ptr.vmem [resolvable:$true] %s160_s30 }
  0x13   : > { %s894_s27 = scalar_select %p726_p8, 1, 0 }
  0x14   : > { %p418_p10 = pneg %p726_p8  ;;  %p492_p12 = scmp.ne.s32.totalorder %s150_s26, %s491_s5 }
  0x15   : > { %p499_p5 = scmp.lt.s32.totalorder %s150_s26, %s150_s26  ;;  %p500_p7 = scmp.lt.s32.totalorder %s491_s5, %s491_s5 }
  0x16   : > { %p738_p11 = pnand %p418_p10, %p703_p1 }
  0x17   : > { %p501_p9 = por %p500_p7, %p499_p5 }
  0x18   : > { %p493_p13 = pneg %p738_p11 }
  0x1a   : > { %p494_p0 = pnand %p493_p13, %p492_p12 }
  0x1c   : > { %p495_p3 = pneg %p494_p0 }
  0x1e   : > { %p502_p6 = pnand %p501_p9, %p495_p3 }
  0x20   : > { %505 = shalt.err (!%p502_p6)
}
  0x21   : > { %s643_s6 = smov [#allocation6]   ;;  %s506_s7 = scalar_lea.vmem %s161_s30, 16 }
  0x22   : > { %421 = dma.vmem_to_smem (!%p738_p11), %s150_s26, 16, %s643_s6, [#allocation5]  }
  0x23   : > { %p507_p10 = scmp.ne.s32.totalorder %s161_s30, %s506_s7  ;;  %p514_p8 = scmp.lt.s32.totalorder %s161_s30, %s161_s30 }
  0x24   : > { %p515_p2 = scmp.lt.s32.totalorder %s506_s7, %s506_s7 }
  0x25   : > { %p509_p1 = pnand %p507_p10, %p493_p13 }
  0x26   : > { %p516_p12 = por %p515_p2, %p514_p8 }
  0x27   : > { %p510_p4 = pneg %p509_p1 }
  0x29   : > { %p517_p0 = pnand %p516_p12, %p510_p4 }
  0x2b   : > { %520 = shalt.err (!%p517_p0)
}
  0x2c   : > { %s644_s8 = smov [#allocation7]   ;;  %s33_s9 = sadd.s32 1, %s637_s16 }
  0x2d   : > { %424 = dma.vmem_to_smem (!%p738_p11), %s161_s30, 16, %s644_s8, [#allocation8]  }
  0x2e   : > { %s42_s10 = sadd.s32 1, %s629_s14  ;;  %p35_p1 = scmp.ge.s32.totalorder %s33_s9, 2 }
  0x2f   : > { %p49_p2 = scmp.ne.s32.totalorder %s629_s14, %s625_s13  ;;  %p50_p4 = scmp.eq.s32.totalorder %s641_s17, 0 }
  0x30   : > { %p435_p6 = scmp.lt.s32.totalorder %s641_s17, 2  ;;  %s910_s9 = smov (%p35_p1, %s33_s9), 0 }
  0x31   : > { %p51_p8 = por %p50_p4, %p49_p2  ;;  %p896_p9 = scmp.ne.s32.totalorder %s891_s21, 0 }
  0x32   : > { %s37_s18 = ssub.s32 %s637_s16, %s910_s9  ;;  %s171_s19 = sand.u32 1, %s629_s14  }
  0x33   : > { %p758_p13 = por %p896_p9, %p49_p2  ;;  %p40_p3 = scmp.eq.s32.totalorder %s37_s18, 0 }
  0x34   : > { %s389_s24 = sshll.u32 %s171_s19, 1  ;;  %s403_s25 = sshll.u32 %s637_s16, 5 }
  0x35   : > { %s767_s26 = scalar_select %p40_p3, %s629_s14, %s42_s10  }
  0x36   : > { %s772_s30 = scalar_lea.hbm %s882_s0, %s403_s25  ;;  %s175_s21 = scalar_lea.vmem [#allocation2], %s389_s24 }
  0x37   : > { %s185_s4 = sshll.u32 %s175_s21, 4  ;;  %p776_p11 = pnand %p435_p6, %p51_p8  ;;  %s780_s4 = int_to_ptr.vmem [resolvable:$true] %s185_s4 }
  0x38   : > { %s172_s6 = scalar_lea.sflag [#allocation3], %s171_s19  ;;  %s521_s7 = scalar_lea.hbm %s772_s30, 32 }
  0x39   : > { %p522_p5 = scmp.ne.s32.totalorder %s772_s30, %s521_s7  ;;  %p523_p7 = pneg %p776_p11 }
  0x3a   : > { %s526_s18 = scalar_lea.hbm %s882_s0, 64  ;;  %p527_p0 = scmp.lt.u32.totalorder %s772_s30, %s882_s0 }
  0x3b   : > { %p524_p10 = pnand %p523_p7, %p522_p5  ;;  %p528_p1 = scmp.lt.u32.totalorder %s526_s18, %s521_s7 }
  0x3c   : > { %p530_p4 = scmp.lt.u32.totalorder %s521_s7, %s772_s30 }
  0x3d   : > { %p525_p12 = pneg %p524_p10  ;;  %p529_p2 = por %p528_p1, %p527_p0 }
  0x3f   : > { %p531_p6 = por %p530_p4, %p529_p2 }
  0x41   : > { %p532_p8 = pnand %p531_p6, %p525_p12 }
  0x43   : > { %535 = shalt.err (!%p532_p8)
}
  0x44   : > { %s536_s19 = scalar_lea.vmem %s780_s4, 32  ;;  %s645_s28 = smov [#allocation2]  }
  0x45   : > { %p537_p9 = scmp.ne.s32.totalorder %s780_s4, %s536_s19  ;;  %s541_s29 = sshll.u32 %s645_s28, 4  ;;  %s542_s29 = int_to_ptr.vmem [resolvable:$false] %s541_s29 }
  0x46   : > { %s543_s21 = scalar_lea.vmem %s542_s29, 64  ;;  %p544_p10 = scmp.lt.s32.totalorder %s780_s4, %s542_s29 }
  0x47   : > { %p539_p3 = pnand %p537_p9, %p523_p7  ;;  %p545_p0 = scmp.lt.s32.totalorder %s543_s21, %s536_s19 }
  0x49   : > { %p540_p5 = pneg %p539_p3  ;;  %p546_p1 = por %p545_p0, %p544_p10 }
  0x4b   : > { %p547_p2 = pnand %p546_p1, %p540_p5 }
  0x4d   : > { %550 = shalt.err (!%p547_p2)
}
  0x4e   : > { %428 = dma.hbm_to_vmem [thread:$0]  (!%p776_p11), %s772_s30, 32, %s780_s4, %s172_s6  }
  0x4f   : > { %p899_p12 = scmp.ne.s32.totalorder %s894_s27, 0 }
  0x50   : > { %s810_s7 = sand.u32 (!%p899_p12), 1, %s625_s13   ;;  %p900_p7 = scmp.ne.s32.totalorder (!%p899_p12), %s892_s22, 0 }
  0x51   : > { %194 = sbr.rel (%p899_p12) target bundleno = 126 (0x7e), region = 32  ;;  %s393_s8 = sshll.u32 (!%p899_p12), %s810_s7, 1 }
  0x52   : > { %s197_s10 = scalar_lea.sflag (!%p899_p12), [#allocation3], %s810_s7  ;;  %s200_s18 = scalar_lea.vmem (!%p899_p12), [#allocation2], %s393_s8 }
  0x58   : > { %604 = dma.done.wait (%p900_p7), %s197_s10, 32  }
  0x59   : > { %606 = vsyncadd (%p900_p7), %s197_s10, 4294967264  ;;  %p901_p4 = scmp.ne.s32.totalorder %s890_s20, 0 }
  0x5b   : > { %608 = dma.done.wait (%p901_p4), [#allocation5], 16  }
  0x5c   : > { %610 = vsyncadd (%p901_p4), [#allocation5], 4294967280 }
  0x5d   : > { %612 = dma.done.wait (%p901_p4), [#allocation8], 16  }
  0x5e   : > { %614 = vsyncadd (%p901_p4), [#allocation8], 4294967280 }
  0x5f   : > { %213 = sfence }
  0x60   : > { %s404_s27 = smul.u32 6, %s810_s7  ;;  %s233_s30 = sld [smem:[#allocation6]]  ;;  %v232_v0 = vld [vmem:[%s200_s18] sm:$0x3]  ;;  %v251_v1 = vlaneseq }
  0x61   : > { %s236_s4 = sld [smem:[#allocation7]]  ;;  %s396_s22 = sld [smem:[#allocation6 + $0x1]] }
  0x62   : > { %s397_s5 = sld [smem:[#allocation7 + $0x1]]  ;;  %s398_s6 = sld [smem:[#allocation6 + $0x2]]  ;;  %vm253_vm0 = vcmp.lt.s32.totalorder %v251_v1, 256 }
  0x63   : > { %s399_s24 = sld [smem:[#allocation7 + $0x2]]  ;;  %s231_s25 = scalar_lea.vmem [#allocation9], %s404_s27 }
  0x64   : > { %s274_s19 = sshll.u32 %s231_s25, 4  ;;  %s405_s20 = smul.u32 96, %s633_s15  ;;  %s828_s19 = int_to_ptr.vmem [resolvable:$true] %s274_s19 }
  0x65   : > { %s259_s15 = scalar_lea.sflag [#allocation4], %s810_s7  ;;  %s551_s8 = scalar_lea.vmem %s828_s19, 96 }
  0x66   : > { %v234_v2 = vstv %s233_s30  ;;  %s833_s21 = scalar_lea.hbm %s885_s3, %s405_s20  ;;  %p552_p11 = scmp.ne.s32.totalorder %s828_s19, %s551_s8 }
  0x67   : > { %v235_v3 = vmul.f32 %v234_v2, %v232_v0  ;;  %v237_v4 = vstv %s236_s4  ;;  %v240_v5 = vstv %s396_s22  ;;  %s646_s10 = smov [#allocation9]  }
  0x68   : > { %v241_v6 = vmul.f32 %v240_v5, %v232_v0  ;;  %v243_v7 = vstv %s397_s5  ;;  %v246_v9 = vstv %s398_s6  ;;  %p553_p6 = pnand %p552_p11, %p758_p13  ;;  %s555_s18 = sshll.u32 %s646_s10, 4  ;;  %s556_s18 = int_to_ptr.vmem [resolvable:$false] %s555_s18 }
  0x69   : > { %v238_v8 = vadd.f32 %v237_v4, %v235_v3  ;;  %v247_v11 = vmul.f32 %v246_v9, %v232_v0  ;;  %v249_v12 = vstv %s399_s24  ;;  %s557_s27 = scalar_lea.vmem %s556_s18, 192  ;;  %p558_p9 = scmp.lt.s32.totalorder %s828_s19, %s556_s18 }
  0x6a   : > { %v244_v10 = vadd.f32 %v243_v7, %v241_v6  ;;  %p554_p8 = pneg %p553_p6  ;;  %p559_p3 = scmp.lt.s32.totalorder %s557_s27, %s551_s8 }
  0x6b   : > { %255 = vst.msk [vmem:[%s231_s25] sm:$0x3] %vm253_vm0, %v238_v8  ;;  %v250_v13 = vadd.f32 %v249_v12, %v247_v11 }
  0x6c   : > { %256 = vst.msk [vmem:[%s231_s25 + $0x2] sm:$0x3] %vm253_vm0, %v244_v10  ;;  %p560_p5 = por %p559_p3, %p558_p9 }
  0x6d   : > { %257 = vst.msk [vmem:[%s231_s25 + $0x4] sm:$0x3] %vm253_vm0, %v250_v13 }
  0x6e   : > { %p561_p10 = pnand %p560_p5, %p554_p8 }
  0x70   : > { %564 = shalt.err (!%p561_p10)
}
  0x71   : > { %s565_s30 = scalar_lea.hbm %s833_s21, 96  ;;  %s569_s5 = scalar_lea.hbm %s885_s3, 192 }
  0x72   : > { %p566_p0 = scmp.ne.s32.totalorder %s833_s21, %s565_s30  ;;  %p570_p12 = scmp.lt.u32.totalorder %s833_s21, %s885_s3 }
  0x73   : > { %p571_p7 = scmp.lt.u32.totalorder %s569_s5, %s565_s30  ;;  %p573_p11 = scmp.lt.u32.totalorder %s565_s30, %s833_s21 }
  0x74   : > { %p567_p1 = pnand %p566_p0, %p758_p13 }
  0x75   : > { %p572_p4 = por %p571_p7, %p570_p12 }
  0x76   : > { %p568_p2 = pneg %p567_p1 }
  0x77   : > { %p574_p6 = por %p573_p11, %p572_p4 }
  0x79   : > { %p575_p8 = pnand %p574_p6, %p568_p2 }
  0x7b   : > { %578 = shalt.err (!%p575_p8)
}
  0x7c   : > { %s647_s25 = smov 32   ;;  %s648_s20 = smov 2  }
  0x7d   : > { %416 = dma.vmem_to_hbm [thread:$0]  (%p758_p13), %s828_s19, 96, %s833_s21, %s259_s15, %s647_s25, %s647_s25, %s648_s20  }
  0x7e PF: > { %s289_s28 = sand.u32 1, %s621_s12   ;;  %p902_p9 = scmp.ne.s32.totalorder %s893_s23, 0 }
  0x7f   : > { %p903_p3 = scmp.ge.s32.totalorder %s641_s17, 2  ;;  %s290_s29 = scalar_lea.sflag [#allocation4], %s289_s28 }
  0x81   : > { %p430_p5 = pnand %p903_p3, %p902_p9 }
  0x83   : > { %616 = dma.done.wait (!%p430_p5), %s290_s29, 96  }
  0x84   : > { %618 = vsyncadd (!%p430_p5), %s290_s29, 4294967200  ;;  %s21_s17 = sadd.s32 1, %s641_s17   ;;  %s904_s12 = smov %s625_s13 }
  0x85   : > { %p18_p10 = scmp.ge.s32.totalorder %s21_s17, 4   ;;  %s905_s13 = smov %s629_s14 }
  0x86   : > { %s906_s14 = smov %s767_s26  ;;  %s907_s15 = smov %s637_s16 }
  0x87   : > { %s908_s16 = smov %s910_s9  ;;  %20 = sbr.rel (!%p18_p10) target bundleno = 8 (0x8), region = 86 }
  0x8e   :  { %295 = vsyncpa [#allocation3], 1 }
  0x8f   :  { %297 = vsyncpa [#allocation3 + $0x1], 1 }
  0x90   :  { %298 = vsyncpa [#allocation4], 1 }
  0x91   :  { %300 = vsyncpa [#allocation4 + $0x1], 1 }
  0x92   :  { %301 = vsyncpa [#allocation5], 1 }
  0x93   :  { %303 = vsyncpa [#allocation5 + $0x1], 1 }
  0x94   :  { %304 = vsyncpa [#allocation8], 1 }

</bundles_post_ra>
